<compile_context>
chip_gen: v7x
topology: tpu7x:2x2x1
jax: 0.10.0
libtpu: 0.0.40
codegen_flags: <defaults>
</compile_context>

<pallas_src>
import functools
import math

import numpy as np
import jax
import jax.numpy as jnp
from jax.experimental import pallas as pl
from jax.experimental.pallas import tpu as pltpu


# ----------------------------------------------------------------------------
# Helpers: torch-exact adaptive average pooling expressed as matrices.
# ----------------------------------------------------------------------------
def _adaptive_pool_matrix(in_size: int, out_size: int) -> np.ndarray:
    """Return M (out_size, in_size) s.t. out = M @ in == torch adaptive_avg_pool1d."""
    mat = np.zeros((out_size, in_size), dtype=np.float32)
    for i in range(out_size):
        start = (i * in_size) // out_size
        end = -(-((i + 1) * in_size) // out_size)  # ceil
        mat[i, start:end] = 1.0 / float(end - start)
    return mat


def _round_up(v: int, m: int) -> int:
    return ((v + m - 1) // m) * m


def _choose_row_tile(mn: int, p: int, budget_bytes: int = 10 * 1024 * 1024) -> int:
    """Largest power-of-two row tile whose double-buffered apply working set
    (x in + out + att in, x2 buffers, plus the resident upsample matrix) stays
    inside a conservative VMEM budget — safe under v5e(16MiB)/v6e(32)/v7x(32)
    default scoped limits."""
    tr = 1024
    while tr > 8 and 4 * (4 * tr * mn + 4 * tr * p + 2 * p * mn) > budget_bytes:
        tr //= 2
    return tr


# ----------------------------------------------------------------------------
# Kernel 1: adaptive pool (H,W)->(LS,LS) + folded global mean as one matmul.
# ----------------------------------------------------------------------------
def _pool_kernel(x_ref, wpool_ref, out_ref):
    out_ref[...] = jnp.dot(x_ref[...], wpool_ref[...],
                           preferred_element_type=jnp.float32)


# ----------------------------------------------------------------------------
# Kernel 2: fused Conv1d(k)+sigmoid for the local AND global branches, plus the
# cross-batch adaptive pool of the global branch (Bpool @ sigmoid(y_global)).
# Sequences are pre-padded on the lane axis; weights sit in SMEM.
# ----------------------------------------------------------------------------
def _att_kernel(seql_ref, seqg_ref, wl_ref, wg_ref, bpool_ref,
                attl_ref, ag_ref, *, k, l_loc, l_glob):
    accl = wl_ref[0, 0] * seql_ref[:, 0:l_loc]
    accg = wg_ref[0, 0] * seqg_ref[:, 0:l_glob]
    for j in range(1, k):
        accl = accl + wl_ref[0, j] * seql_ref[:, j:j + l_loc]
        accg = accg + wg_ref[0, j] * seqg_ref[:, j:j + l_glob]
    attl_ref[...] = jax.nn.sigmoid(accl)
    sig_g = jax.nn.sigmoid(accg)                              # (Bp, C)
    # (LSp, Bp) @ (Bp, C): both sublane dims padded to multiples of 8; the
    # zero-padded rows/cols contribute nothing.
    ag_ref[...] = jnp.dot(bpool_ref[...], sig_g,
                          preferred_element_type=jnp.float32)


# ----------------------------------------------------------------------------
# Kernel 3: adaptive "upsample" (LS,LS)->(H,W) via matmul + x * att.
# ----------------------------------------------------------------------------
def _apply_kernel(x_ref, att_ref, wup_ref, out_ref):
    att_up = jnp.dot(att_ref[...], wup_ref[...],
                     preferred_element_type=jnp.float32)
    out_ref[...] = x_ref[...] * att_up


# ----------------------------------------------------------------------------
# Full MLCA forward.
# ----------------------------------------------------------------------------
def mlca_forward(x, w_local, w_global, local_size=5, local_weight=0.5,
                 row_tile=None):
    B, C, M, N = x.shape
    LS = int(local_size)
    LSS = LS * LS
    MN = M * N
    BC = B * C
    k = int(w_local.shape[-1])
    pad = (k - 1) // 2
    P = _round_up(LSS + 1, 128)          # lane-dense attention width (25+1 -> 128)

    # ---- Precomputed pooling matrices (deterministic numpy glue) ------------
    Ph = _adaptive_pool_matrix(M, LS)                        # (LS, M)
    Pw = _adaptive_pool_matrix(N, LS)                        # (LS, N)
    Wpool = np.einsum("im,jn->mnij", Ph, Pw).reshape(MN, LSS)
    Wpool_ext = np.zeros((MN, P), np.float32)
    Wpool_ext[:, :LSS] = Wpool
    # Global branch = AdaptiveAvgPool2d(1)(local_arv) = mean of the LS*LS bin
    # means -> fold it in as one extra matmul column.
    Wpool_ext[:, LSS] = Wpool.mean(axis=1)
    Wpool_ext = jnp.asarray(Wpool_ext)

    Uh = _adaptive_pool_matrix(LS, M)                        # (M, LS)
    Uw = _adaptive_pool_matrix(LS, N)                        # (N, LS)
    Wup = np.einsum("mi,nj->ijmn", Uh, Uw).reshape(LSS, MN)
    Wup_ext = np.zeros((P, MN), np.float32)
    Wup_ext[:LSS, :] = Wup
    Wup_ext = jnp.asarray(Wup_ext)

    # Cross-batch adaptive pool matrix of the global branch, padded to
    # sublane-aligned (LSp, Bp) so the in-kernel matmul is 8-aligned.
    LSp = _round_up(LS, 8)
    Bp = _round_up(B, 8)
    Bpool_np = _adaptive_pool_matrix(B, LS)                  # (LS, B)
    Bpool_pad = np.zeros((LSp, Bp), np.float32)
    Bpool_pad[:LS, :B] = Bpool_np
    Bpool_pad = jnp.asarray(Bpool_pad)

    x_flat = x.reshape(BC, MN).astype(jnp.float32)
    w_local = w_local.astype(jnp.float32)
    w_global = w_global.astype(jnp.float32)

    # ---- Row tiling over B*C -------------------------------------------------
    tr = row_tile if row_tile is not None else _choose_row_tile(MN, P)
    if tr >= BC:
        tr = BC                                   # one full-extent block
    elif tr % 8:
        tr = _round_up(tr, 8)
    nb = pl.cdiv(BC, tr)
    par = pltpu.CompilerParams(dimension_semantics=("parallel",))

    # ---- Kernel 1: local pool + global mean ---------------------------------
    pooled = pl.pallas_call(
        _pool_kernel,
        grid=(nb,),
        in_specs=[pl.BlockSpec((tr, MN), lambda i: (i, 0)),
                  pl.BlockSpec((MN, P), lambda i: (0, 0))],
        out_specs=pl.BlockSpec((tr, P), lambda i: (i, 0)),
        out_shape=jax.ShapeDtypeStruct((BC, P), jnp.float32),
        compiler_params=par,
        cost_estimate=pl.CostEstimate(
            flops=2 * BC * MN * P, transcendentals=0,
            bytes_accessed=4 * (BC * MN + MN * P + BC * P)),
    )(x_flat, Wpool_ext)

    # ---- Tiny glue: build the Conv1d sequences like the torch views ---------
    local_flat = pooled[:, :LSS]                              # (BC, LSS)
    seq_local = (local_flat.reshape(B, C, LSS)
                 .transpose(0, 2, 1).reshape(B, LSS * C))     # spatial-major
    seq_global = pooled[:, LSS].reshape(B, C)                 # (B, C)
    seq_local_pad = jnp.pad(seq_local, ((0, 0), (pad, pad)))
    seq_global_pad = jnp.pad(seq_global, ((0, Bp - B), (pad, pad)))

    # ---- Kernel 2: fused convs + sigmoids + cross-batch pool ----------------
    att_local_seq, ag_pad = pl.pallas_call(
        functools.partial(_att_kernel, k=k, l_loc=LSS * C, l_glob=C),
        in_specs=[
            pl.BlockSpec(memory_space=pltpu.MemorySpace.VMEM),
            pl.BlockSpec(memory_space=pltpu.MemorySpace.VMEM),
            pl.BlockSpec(memory_space=pltpu.MemorySpace.SMEM),
            pl.BlockSpec(memory_space=pltpu.MemorySpace.SMEM),
            pl.BlockSpec(memory_space=pltpu.MemorySpace.VMEM),
        ],
        out_specs=(pl.BlockSpec(memory_space=pltpu.MemorySpace.VMEM),
                   pl.BlockSpec(memory_space=pltpu.MemorySpace.VMEM)),
        out_shape=(jax.ShapeDtypeStruct((B, LSS * C), jnp.float32),
                   jax.ShapeDtypeStruct((LSp, C), jnp.float32)),
    )(seq_local_pad, seq_global_pad, w_local, w_global, Bpool_pad)

    # ---- Tiny glue: undo seq transpose, broadcast global, blend, lane-pad ---
    att_local = (att_local_seq.reshape(B, LSS, C)
                 .transpose(0, 2, 1).reshape(BC, LSS))
    att_global = jnp.broadcast_to(
        ag_pad.T[None, :, :LS, None], (B, C, LS, LS)).reshape(BC, LSS)
    comb = local_weight * att_local + (1.0 - local_weight) * att_global
    comb_pad = jnp.pad(comb, ((0, 0), (0, P - LSS)))          # (BC, P)

    # ---- Kernel 3: upsample + apply (the big mem-bound pass) ----------------
    out_flat = pl.pallas_call(
        _apply_kernel,
        grid=(nb,),
        in_specs=[pl.BlockSpec((tr, MN), lambda i: (i, 0)),
                  pl.BlockSpec((tr, P), lambda i: (i, 0)),
                  pl.BlockSpec((P, MN), lambda i: (0, 0))],
        out_specs=pl.BlockSpec((tr, MN), lambda i: (i, 0)),
        out_shape=jax.ShapeDtypeStruct((BC, MN), jnp.float32),
        compiler_params=par,
        cost_estimate=pl.CostEstimate(
            flops=2 * BC * P * MN + BC * MN, transcendentals=0,
            bytes_accessed=4 * (2 * BC * MN + BC * P + P * MN)),
    )(x_flat, comb_pad, Wup_ext)

    return out_flat.reshape(B, C, M, N)


# ----------------------------------------------------------------------------
# Pure-JAX reference (mirrors the torch forward) for sanity checking.
# ----------------------------------------------------------------------------
def mlca_reference(x, w_local, w_global, local_size=5, local_weight=0.5):
    B, C, M, N = x.shape
    LS = local_size
    k = w_local.shape[-1]
    pad = (k - 1) // 2
    Ph = jnp.asarray(_adaptive_pool_matrix(M, LS))
    Pw = jnp.asarray(_adaptive_pool_matrix(N, LS))
    local_arv = jnp.einsum("im,bcmn,jn->bcij", Ph, x, Pw)
    global_arv = jnp.mean(local_arv, axis=(2, 3))             # (B, C)
    seq_local = (local_arv.reshape(B, C, LS * LS)
                 .transpose(0, 2, 1).reshape(B, LS * LS * C))

    def corr1d(seq, w):
        sp = jnp.pad(seq, ((0, 0), (pad, pad)))
        return sum(w[0, j] * sp[:, j:j + seq.shape[1]] for j in range(k))

    y_local = corr1d(seq_local, w_local)
    y_global = corr1d(global_arv, w_global)
    att_local = (jax.nn.sigmoid(y_local).reshape(B, LS * LS, C)
                 .transpose(0, 2, 1).reshape(B, C, LS, LS))
    Bpool = jnp.asarray(_adaptive_pool_matrix(B, LS))
    ag_5c = Bpool @ jax.nn.sigmoid(y_global)                  # (LS, C)
    att_global = jnp.broadcast_to(ag_5c.T[None, :, :, None], (B, C, LS, LS))
    comb = att_global * (1 - local_weight) + att_local * local_weight
    Uh = jnp.asarray(_adaptive_pool_matrix(LS, M))
    Uw = jnp.asarray(_adaptive_pool_matrix(LS, N))
    att_all = jnp.einsum("mi,bcij,nj->bcmn", Uh, comb, Uw)
    return x * att_all


if __name__ == "__main__":
    def make_inputs(B, C, M, N, seed=0, gamma=2, b_param=1):
        # Kernel size exactly as the torch __init__ computes it from in_size=C.
        t = int(abs(math.log(C, 2) + b_param) / gamma)
        k = t if t % 2 else t + 1
        key = jax.random.PRNGKey(seed)
        kx, kw1, kw2 = jax.random.split(key, 3)
        x = jax.random.normal(kx, (B, C, M, N), dtype=jnp.float32)
        w_local = jax.random.normal(kw1, (1, k), dtype=jnp.float32) * 0.3
        w_global = jax.random.normal(kw2, (1, k), dtype=jnp.float32) * 0.3
        return x, w_local, w_global

    # Case 1: small shapes consistent with the module (B=2, C=8, 16x16).
    x, wl, wg = make_inputs(2, 8, 16, 16, seed=0)
    out = jax.block_until_ready(mlca_forward(x, wl, wg))
    ref = jax.block_until_ready(mlca_reference(x, wl, wg))
    assert out.shape == x.shape
    np.testing.assert_allclose(np.asarray(out), np.asarray(ref),
                               rtol=1e-5, atol=1e-5)

    # Case 2: more channels with a forced small row tile so the pipelined
    # multi-block grid path (grid > 1, parallel axis) is exercised.
    x2, wl2, wg2 = make_inputs(2, 64, 16, 16, seed=1)
    out2 = jax.block_until_ready(mlca_forward(x2, wl2, wg2, row_tile=32))
    ref2 = jax.block_until_ready(mlca_reference(x2, wl2, wg2))
    np.testing.assert_allclose(np.asarray(out2), np.asarray(ref2),
                               rtol=1e-5, atol=1e-5)

    print("KERNEL_OK")
</pallas_src>

<mosaic_0001>
module attributes {stable_mosaic.version = 11 : i64} {
  func.func @_pool_kernel(%arg0: i32, %arg1: memref<16x256xf32, #tpu.memory_space<vmem>>, %arg2: memref<256x128xf32, #tpu.memory_space<vmem>>, %arg3: memref<16x128xf32, #tpu.memory_space<vmem>>) attributes {dimension_semantics = [#tpu.dimension_semantics<parallel>], iteration_bounds = array<i64: 1>, scalar_prefetch = 0 : i64, scratch_operands = 0 : i64, tpu.core_type = #tpu.core_type<tc>, window_params = [{transform_indices = @transform_0, window_bounds = array<i64: 16, 256>}, {pipeline_mode = #tpu.pipeline_mode<synchronous>, transform_indices = @transform_1, window_bounds = array<i64: 256, 128>}, {transform_indices = @transform_2, window_bounds = array<i64: 16, 128>}]} {
    %c0 = arith.constant 0 : index
    %c0_0 = arith.constant 0 : index
    %0 = vector.load %arg1[%c0, %c0_0] : memref<16x256xf32, #tpu.memory_space<vmem>>, vector<16x256xf32>
    %c0_1 = arith.constant 0 : index
    %c0_2 = arith.constant 0 : index
    %1 = vector.load %arg2[%c0_1, %c0_2] : memref<256x128xf32, #tpu.memory_space<vmem>>, vector<256x128xf32>
    %cst = arith.constant dense<0.000000e+00> : vector<16x128xf32>
    %2 = tpu.matmul %0, %1, %cst {dimension_numbers = #tpu.dot_dimension_numbers<[1], [0], [0], [1], [0, 0, 1, 1], [], []>} : vector<16x256xf32>, vector<256x128xf32>, vector<16x128xf32> -> vector<16x128xf32>
    %c0_3 = arith.constant 0 : index
    %c0_4 = arith.constant 0 : index
    %3 = vector.load %arg3[%c0_3, %c0_4] : memref<16x128xf32, #tpu.memory_space<vmem>>, vector<16x128xf32>
    tpu.vector_store %arg3[%c0_3, %c0_4], %2 {strides = array<i32>} : memref<16x128xf32, #tpu.memory_space<vmem>>, vector<16x128xf32>,
    return
  }
  func.func @transform_0(%arg0: i32) -> (i32, i32) {
    %c0_i32 = arith.constant 0 : i32
    %c0_i32_0 = arith.constant 0 : i32
    return %arg0, %c0_i32 : i32, i32
  }
  func.func @transform_1(%arg0: i32) -> (i32, i32) {
    %c0_i32 = arith.constant 0 : i32
    %c0_i32_0 = arith.constant 0 : i32
    %c0_i32_1 = arith.constant 0 : i32
    return %c0_i32, %c0_i32_0 : i32, i32
  }
  func.func @transform_2(%arg0: i32) -> (i32, i32) {
    %c0_i32 = arith.constant 0 : i32
    %c0_i32_0 = arith.constant 0 : i32
    return %arg0, %c0_i32 : i32, i32
  }
}

</mosaic_0001>

<bundles_post_ra>
// kernel: tpu_custom_call.1
= control target key start
LH: loop header
LB: loop body
LE: loop exit
PB: predicated region body
PF: predicated region fallthrough
CT: control target
= control target key end

     0   :  { %7 = vsyncpa [#allocation3], 0  ;;  %s400_s0 = inlined_call_operand.hbm [shape: f32[16,256], index: 0, kind: input, shape index: {}]   ;;  %s401_s1 = inlined_call_operand.hbm [shape: f32[256,128], index: 1, kind: input, shape index: {}]   ;;  %s402_s2 = inlined_call_operand.hbm [shape: f32[16,128], index: 2, kind: output, shape index: {}]  }
   0x1   :  { %8 = vsyncpa [#allocation6], 0 }
   0x2   :  { %9 = vsyncpa [#allocation4], 0  ;;  %s336_s9 = smov [#allocation2]   ;;  %s264_s13 = scalar_lea.hbm %s400_s0, 512 }
   0x3   :  { %s15_s10 = sshll.u32 %s336_s9, 4  ;;  %p265_p0 = scmp.ne.s32.totalorder %s400_s0, %s264_s13  ;;  %s16_s10 = int_to_ptr.vmem [resolvable:$true] %s15_s10 }
   0x4   :  { %p268_p1 = scmp.lt.u32.totalorder %s264_s13, %s400_s0 }
   0x6   :  { %p270_p2 = pnand %p268_p1, %p265_p0 }
   0x8   :  { %273 = shalt.err (!%p270_p2)
}
   0x9   :  { %s274_s18 = scalar_lea.vmem %s16_s10, 512  ;;  %p279_p4 = scmp.lt.s32.totalorder %s16_s10, %s16_s10 }
   0xa   :  { %p275_p3 = scmp.ne.s32.totalorder %s16_s10, %s274_s18  ;;  %p280_p5 = scmp.lt.s32.totalorder %s274_s18, %s274_s18 }
   0xc   :  { %p281_p6 = por %p280_p5, %p279_p4 }
   0xe   :  { %p282_p7 = pnand %p281_p6, %p275_p3 }
  0x10   :  { %285 = shalt.err (!%p282_p7)
}
  0x11   :  { %s337_s19 = smov 256   ;;  %s338_s20 = smov 16  }
  0x12   :  { %21 = dma.hbm_to_vmem [thread:$0]  %s400_s0, 512, %s16_s10, [#allocation3], %s337_s19, %s337_s19, %s338_s20  }
  0x13   :  { %s339_s23 = smov [#allocation5]   ;;  %s286_s27 = scalar_lea.hbm %s401_s1, 4096 }
  0x14   :  { %s27_s24 = sshll.u32 %s339_s23, 4  ;;  %p287_p8 = scmp.ne.s32.totalorder %s401_s1, %s286_s27  ;;  %s28_s24 = int_to_ptr.vmem [resolvable:$true] %s27_s24 }
  0x15   :  { %p290_p9 = scmp.lt.u32.totalorder %s286_s27, %s401_s1 }
  0x17   :  { %p292_p10 = pnand %p290_p9, %p287_p8 }
  0x19   :  { %295 = shalt.err (!%p292_p10)
}
  0x1a   :  { %s296_s4 = scalar_lea.vmem %s28_s24, 4096  ;;  %p301_p12 = scmp.lt.s32.totalorder %s28_s24, %s28_s24 }
  0x1b   :  { %p297_p11 = scmp.ne.s32.totalorder %s28_s24, %s296_s4  ;;  %p302_p13 = scmp.lt.s32.totalorder %s296_s4, %s296_s4 }
  0x1d   :  { %p303_p0 = por %p302_p13, %p301_p12 }
  0x1f   :  { %p304_p1 = pnand %p303_p0, %p297_p11 }
  0x21   :  { %307 = shalt.err (!%p304_p1)
}
  0x22   :  { %s340_s0 = smov 128   ;;  %s341_s5 = smov 8  }
  0x23   :  { %33 = dma.hbm_to_vmem [thread:$0]  %s401_s1, 4096, %s28_s24, [#allocation6], %s340_s0, %s340_s0, %s341_s5  }
  0x24   :  { %330 = dma.done.wait [#allocation3], 512  }
  0x25   :  { %331 = vsyncadd [#allocation3], 4294966784 }
  0x26   :  { %332 = dma.done.wait [#allocation6], 4096  }
  0x27   :  { %333 = vsyncadd [#allocation6], 4294963200  ;;  %v60_v0 = vld [vmem:[#allocation5 + $0x80] sm:$0xff]  ;;  %v61_v1 = vld [vmem:[#allocation5 + $0x88] sm:$0xff]  ;;  %s342_s1 = smov [#allocation7]  }
  0x28   :  { %v44_v2 = vld [vmem:[#allocation5] sm:$0xff]  ;;  %v209_v3 = vpack.c.bf16 %v61_v1, %v60_v0  ;;  %v45_v4 = vld [vmem:[#allocation5 + $0x8] sm:$0xff]  ;;  %v62_v5 = vld [vmem:[#allocation5 + $0x90] sm:$0xff]  ;;  %s158_s8 = sshll.u32 %s342_s1, 4  ;;  %s159_s8 = int_to_ptr.vmem [resolvable:$true] %s158_s8 }
  0x29   :  { %v63_v6 = vld [vmem:[#allocation5 + $0x98] sm:$0xff]  ;;  %v211_v7 = vpack.c.bf16 %v45_v4, %v44_v2  ;;  %v46_v9 = vld [vmem:[#allocation5 + $0x10] sm:$0xff]  ;;  %v64_v11 = vld [vmem:[#allocation5 + $0xa0] sm:$0xff]  ;;  %s308_s9 = scalar_lea.vmem %s159_s8, 256  ;;  %p313_p3 = scmp.lt.s32.totalorder %s159_s8, %s159_s8 }
  0x2a   :  { %v213_v8 = vpack.c.bf16 %v63_v6, %v62_v5  ;;  %v47_v10 = vld [vmem:[#allocation5 + $0x18] sm:$0xff]  ;;  %210 = vmatprep.subr.bf16.mxu0 %v209_v3  ;;  %241 = vmatprep.subr.bf16.mxu1 %v209_v3  ;;  %v65_v12 = vld [vmem:[#allocation5 + $0xa8] sm:$0xff]  ;;  %v48_v15 = vld [vmem:[#allocation5 + $0x20] sm:$0xff]  ;;  %p309_p2 = scmp.ne.s32.totalorder %s159_s8, %s308_s9  ;;  %p314_p4 = scmp.lt.s32.totalorder %s308_s9, %s308_s9 }
  0x2b   :  { %212 = vmatpush3.bf16.msra.mxu0 %v211_v7  ;;  %249 = vmatpush3.bf16.msra.mxu1 %v211_v7  ;;  %v215_v13 = vpack.c.bf16 %v47_v10, %v46_v9  ;;  %v217_v14 = vpack.c.bf16 %v65_v12, %v64_v11  ;;  %v49_v16 = vld [vmem:[#allocation5 + $0x28] sm:$0xff]  ;;  %v66_v17 = vld [vmem:[#allocation5 + $0xb0] sm:$0xff]  ;;  %v67_v18 = vld [vmem:[#allocation5 + $0xb8] sm:$0xff] }
  0x2c   :  { %214 = vmatprep.subr.bf16.mxu0 %v213_v8  ;;  %242 = vmatprep.subr.bf16.mxu1 %v213_v8  ;;  %v219_v19 = vpack.c.bf16 %v49_v16, %v48_v15  ;;  %v221_v20 = vpack.c.bf16 %v67_v18, %v66_v17  ;;  %v50_v21 = vld [vmem:[#allocation5 + $0x30] sm:$0xff]  ;;  %v51_v22 = vld [vmem:[#allocation5 + $0x38] sm:$0xff]  ;;  %v68_v23 = vld [vmem:[#allocation5 + $0xc0] sm:$0xff]  ;;  %p315_p5 = por %p314_p4, %p313_p3 }
  0x2d   :  { %v69_v24 = vld [vmem:[#allocation5 + $0xc8] sm:$0xff]  ;;  %v43_v26 = vld [vmem:[#allocation2 + $0x18] sm:$0xff]  ;;  %v223_v27 = vpack.c.bf16 %v51_v22, %v50_v21  ;;  %v52_v29 = vld [vmem:[#allocation5 + $0x40] sm:$0xff] }
  0x2e   :  { %v41_v25 = vld [vmem:[#allocation2 + $0x8] sm:$0xff]  ;;  %v225_v28 = vpack.c.bf16 %v69_v24, %v68_v23  ;;  %v70_v31 = vld [vmem:[#allocation5 + $0xd0] sm:$0xff]  ;;  %v71_v32 = vld [vmem:[#allocation5 + $0xd8] sm:$0xff]  ;;  %145 = vmatprep.mubr.f32.mxu1 %v43_v26  ;;  %p316_p6 = pnand %p315_p5, %p309_p2 }
  0x2f   :  { %216 = vmatpush3.bf16.msra.mxu0 %v215_v13  ;;  %250 = vmatpush3.bf16.msra.mxu1 %v215_v13  ;;  %v53_v30 = vld [vmem:[#allocation5 + $0x48] sm:$0xff]  ;;  %v229_v34 = vpack.c.bf16 %v71_v32, %v70_v31  ;;  %v54_v35 = vld [vmem:[#allocation5 + $0x50] sm:$0xff]  ;;  %v55_v36 = vld [vmem:[#allocation5 + $0x58] sm:$0xff] }
  0x30   :  { %218 = vmatprep.subr.bf16.mxu0 %v217_v14  ;;  %243 = vmatprep.subr.bf16.mxu1 %v217_v14  ;;  %v227_v33 = vpack.c.bf16 %v53_v30, %v52_v29  ;;  %v72_v37 = vld [vmem:[#allocation5 + $0xe0] sm:$0xff]  ;;  %v73_v38 = vld [vmem:[#allocation5 + $0xe8] sm:$0xff]  ;;  %v231_v39 = vpack.c.bf16 %v55_v36, %v54_v35  ;;  %v74_v43 = vld [vmem:[#allocation5 + $0xf0] sm:$0xff] }
  0x31   :  { %140 = vmatprep.mubr.f32.mxu0 %v41_v25  ;;  %v233_v40 = vpack.c.bf16 %v73_v38, %v72_v37  ;;  %v56_v41 = vld [vmem:[#allocation5 + $0x60] sm:$0xff]  ;;  %v57_v42 = vld [vmem:[#allocation5 + $0x68] sm:$0xff]  ;;  %v75_v44 = vld [vmem:[#allocation5 + $0xf8] sm:$0xff] }
  0x32   :  { %v235_v45 = vpack.c.bf16 %v57_v42, %v56_v41  ;;  %v237_v46 = vpack.c.bf16 %v75_v44, %v74_v43  ;;  %v58_v47 = vld [vmem:[#allocation5 + $0x70] sm:$0xff]  ;;  %v59_v48 = vld [vmem:[#allocation5 + $0x78] sm:$0xff]  ;;  %v40_v50 = vld [vmem:[#allocation2] sm:$0xff] }
  0x33   :  { %220 = vmatpush3.bf16.msra.mxu0 %v219_v19  ;;  %251 = vmatpush3.bf16.msra.mxu1 %v219_v19  ;;  %v239_v49 = vpack.c.bf16 %v59_v48, %v58_v47  ;;  %v42_v51 = vld [vmem:[#allocation2 + $0x10] sm:$0xff] }
  0x34   :  { %222 = vmatprep.subr.bf16.mxu0 %v221_v20  ;;  %244 = vmatprep.subr.bf16.mxu1 %v221_v20 }
  0x37   :  { %224 = vmatpush3.bf16.msra.mxu0 %v223_v27  ;;  %252 = vmatpush3.bf16.msra.mxu1 %v223_v27 }
  0x38   :  { %226 = vmatprep.subr.bf16.mxu0 %v225_v28  ;;  %245 = vmatprep.subr.bf16.mxu1 %v225_v28 }
  0x3b   :  { %228 = vmatpush3.bf16.msra.mxu0 %v227_v33  ;;  %253 = vmatpush3.bf16.msra.mxu1 %v227_v33 }
  0x3c   :  { %230 = vmatprep.subr.bf16.mxu0 %v229_v34  ;;  %246 = vmatprep.subr.bf16.mxu1 %v229_v34 }
  0x3f   :  { %232 = vmatpush3.bf16.msra.mxu0 %v231_v39  ;;  %254 = vmatpush3.bf16.msra.mxu1 %v231_v39 }
  0x40   :  { %234 = vmatprep.subr.bf16.mxu0 %v233_v40  ;;  %247 = vmatprep.subr.bf16.mxu1 %v233_v40 }
  0x43   :  { %236 = vmatpush3.bf16.msra.mxu0 %v235_v45  ;;  %255 = vmatpush3.bf16.msra.mxu1 %v235_v45 }
  0x44   :  { %238 = vmatprep.subr.bf16.mxu0 %v237_v46  ;;  %248 = vmatprep.subr.bf16.mxu1 %v237_v46 }
  0x47   :  { %240 = vmatpush3.bf16.msra.mxu0 %v239_v49  ;;  %256 = vmatpush3.bf16.msra.mxu1 %v239_v49 }
  0x4a   :  { %141 = vmatmul.mubr.f32.vlgmr.msra.gmra.mrb[0].mxu0 %v40_v50  ;;  %146 = vmatmul.mubr.f32.vlgmr.msra.gmra.mrb[0].mxu1 %v42_v51 }
 0x11d   :  { %v203_v52 = vpop.f32.mrb[0].mxu0  ;;  %v206_v53 = vpop.f32.mrb[0].mxu1 }
 0x11e   :  { %v204_v54 = vpop.f32.mrb[1].mxu0  ;;  %v207_v55 = vpop.f32.mrb[1].mxu1 }
 0x11f   :  { %v205_v56 = vadd.f32 %v204_v54, %v203_v52  ;;  %v208_v57 = vadd.f32 %v207_v55, %v206_v53 }
 0x121   :  { %151 = vst [vmem:[#allocation7] sm:$0xff] %v205_v56  ;;  %152 = vst [vmem:[#allocation7 + $0x8] sm:$0xff] %v208_v57 }
 0x122   :  { %319 = shalt.err (!%p316_p6)
}
 0x123   :  { %s320_s12 = scalar_lea.hbm %s402_s2, 256 }
 0x124   :  { %p321_p7 = scmp.ne.s32.totalorder %s402_s2, %s320_s12  ;;  %p324_p8 = scmp.lt.u32.totalorder %s320_s12, %s402_s2 }
 0x126   :  { %p326_p9 = pnand %p324_p8, %p321_p7 }
 0x128   :  { %329 = shalt.err (!%p326_p9)
}
 0x129   :  { %164 = dma.vmem_to_hbm [thread:$0]  %s159_s8, 256, %s402_s2, [#allocation4], %s340_s0, %s340_s0, %s341_s5  }
 0x12a   :  { %334 = dma.done.wait [#allocation4], 256  }
 0x12b   :  { %335 = vsyncadd [#allocation4], 4294967040 }
 0x12c   :  { %168 = vsyncpa [#allocation3], 1 }
 0x12d   :  { %169 = vsyncpa [#allocation6], 1 }
 0x12e   :  { %170 = vsyncpa [#allocation4], 1 }

</bundles_post_ra>
